<compile_context>
chip_gen: v5e
topology: v5e:2x2
jax: 0.10.0
libtpu: 0.0.40
codegen_flags: <defaults>
</compile_context>

<pallas_src>
import jax
import jax.numpy as jnp
import numpy as np
from jax.experimental import pallas as pl
from jax.experimental.pallas import tpu as pltpu


# ----------------------------- Pallas kernel ------------------------------ #
def _block_seq_kernel(start_ref, x_ref, w_ref, b_ref, o_ref, acc_ref):
    """Apply selected block `k = program_id(1)` to the resident activation tile.

    acc_ref (VMEM scratch, f32) carries the activation across the block axis.
    start_ref is only consumed by the BlockSpec index_maps.
    """
    del start_ref
    k = pl.program_id(1)

    # First selected block for this batch tile: load the inputs into the
    # resident f32 accumulator.
    @pl.when(k == 0)
    def _():
        acc_ref[...] = x_ref[...].astype(jnp.float32)

    h = acc_ref[...]                             # (bt, H)  f32
    w = w_ref[...]                               # (H, H)   W_k in (in, out) layout
    # Cast activations to the weight dtype (bf16 fast MXU path when weights are
    # bf16; no-op for f32 weights) and accumulate in f32.
    y = jnp.dot(h.astype(w.dtype), w, preferred_element_type=jnp.float32)
    y = y + b_ref[...].astype(jnp.float32)       # (1, H) broadcast over rows
    acc_ref[...] = jnp.maximum(y, 0.0)

    # Last selected block: cast once and write the output tile.
    @pl.when(k == pl.num_programs(1) - 1)
    def _():
        o_ref[...] = acc_ref[...].astype(o_ref.dtype)


# ------------------------------- wrapper ----------------------------------- #
def _pick_batch_tile(B):
    """Largest power-of-two tile (<=256) dividing B; fall back to full B
    (a block equal to the full array dim is always a legal TPU block)."""
    for t in (256, 128, 64, 32, 16, 8):
        if B % t == 0:
            return t
    return B


def block_forward(x, w_stack, b_stack, start_block=None, end_block=None,
                  batch_tile=None):
    """Pallas equivalent of BlockModule.forward(start_block, end_block, x=x).

    x:        [B, H]                activations
    w_stack:  [N, H, H]             full per-block weight stack, (in, out) layout
                                    (bf16 recommended for streaming; f32 also works)
    b_stack:  [N, 1, H]             per-block bias
    start_block inclusive, end_block exclusive (static Python ints / None).
    """
    n_blocks, H_in, H_out = w_stack.shape
    assert H_in == H_out
    B, H = x.shape
    assert H == H_in

    start_block = 0 if start_block is None else start_block
    end_block = n_blocks if end_block is None else end_block
    assert 0 <= start_block < n_blocks
    assert 0 < end_block <= n_blocks
    assert start_block < end_block
    n_sel = end_block - start_block

    bt = _pick_batch_tile(B) if batch_tile is None else batch_tile
    assert B % bt == 0, "batch_tile must divide the batch size"
    n_bt = B // bt

    # Scalar-prefetched block offset (lives in SMEM; consumed by index_maps).
    start = jnp.asarray([start_block], dtype=jnp.int32)

    # Compiler params; raise the scoped-VMEM limit only when the working set
    # outgrows the tightest default (v5e: 16 MiB).
    w_bytes = H * H * w_stack.dtype.itemsize
    est = 3 * w_bytes + 4 * bt * H * 4 + 4 * H * 4
    ckw = dict(dimension_semantics=("parallel", "arbitrary"))
    if est > 16 * 1024 * 1024:
        ckw["vmem_limit_bytes"] = min(int(est * 3 // 2), 96 * 1024 * 1024)

    return pl.pallas_call(
        _block_seq_kernel,
        out_shape=jax.ShapeDtypeStruct((B, H), x.dtype),
        grid_spec=pltpu.PrefetchScalarGridSpec(
            num_scalar_prefetch=1,
            grid=(n_bt, n_sel),
            in_specs=[
                # activations: one tile per batch-grid index, fetched once per tile
                pl.BlockSpec((bt, H), lambda bi, k, s_ref: (bi, 0)),
                # W_k: indexed off the scalar-prefetched start offset; leading
                # singleton squeezed so the kernel sees (H, H)
                pl.BlockSpec((None, H, H),
                             lambda bi, k, s_ref: (s_ref[0] + k, 0, 0)),
                # b_k: kernel sees (1, H)
                pl.BlockSpec((None, 1, H),
                             lambda bi, k, s_ref: (s_ref[0] + k, 0, 0)),
            ],
            out_specs=pl.BlockSpec((bt, H), lambda bi, k, s_ref: (bi, 0)),
            scratch_shapes=[pltpu.VMEM((bt, H), jnp.float32)],  # resident f32 act
        ),
        compiler_params=pltpu.CompilerParams(**ckw),
    )(start, x, w_stack, b_stack)


# ----------------------------- reference (plain JAX) ----------------------- #
def block_forward_ref(x, w_stack, b_stack, start_block, end_block):
    h = x.astype(jnp.float32)
    for i in range(start_block, end_block):
        w = w_stack[i].astype(jnp.float32)
        b = b_stack[i, 0].astype(jnp.float32)
        h = jnp.maximum(h @ w + b, 0.0)
    return h.astype(x.dtype)


# ---------------------------------- main ----------------------------------- #
if __name__ == "__main__":
    key = jax.random.PRNGKey(0)
    B, H, N_BLOCKS = 16, 128, 4

    kx, kw, kb = jax.random.split(key, 3)
    x = jax.random.normal(kx, (B, H), dtype=jnp.float32)

    # Deterministic synthetic parameters. PyTorch Linear weight is [out, in];
    # build it that way, then transpose to the kernel's (in, out) layout.
    w_pt = 0.05 * jax.random.normal(kw, (N_BLOCKS, H, H), dtype=jnp.float32)  # [N, out, in]
    b_pt = 0.05 * jax.random.normal(kb, (N_BLOCKS, H), dtype=jnp.float32)     # [N, out]

    w_f32 = jnp.transpose(w_pt, (0, 2, 1))            # [N, in, out]
    b_f32 = b_pt.reshape(N_BLOCKS, 1, H)              # [N, 1, out]
    w_bf16 = w_f32.astype(jnp.bfloat16)               # streamed weight format

    # forward(start_block=1, end_block=3, x=x) -> run blocks 1 and 2.
    start_block, end_block = 1, 3

    # 1) Exact structural check (f32 weights), tight tolerance; batch_tile=8
    #    exercises the parallel batch-grid axis (2 tiles).
    out32 = jax.block_until_ready(
        block_forward(x, w_f32, b_f32, start_block, end_block, batch_tile=8))
    ref32 = block_forward_ref(x, w_f32, b_f32, start_block, end_block)
    np.testing.assert_allclose(np.asarray(out32), np.asarray(ref32),
                               rtol=1e-5, atol=1e-5)

    # 2) bf16 weight-streaming path (the perf configuration), looser tolerance
    #    (activations are rounded to bf16 at the MXU input in the kernel).
    out16 = jax.block_until_ready(
        block_forward(x, w_bf16, b_f32, start_block, end_block, batch_tile=8))
    ref16 = block_forward_ref(x, w_bf16, b_f32, start_block, end_block)
    np.testing.assert_allclose(np.asarray(out16), np.asarray(ref16),
                               rtol=2e-2, atol=2e-2)

    # 3) Full-model path (start_block=None, end_block=None), auto batch tile.
    out_full = jax.block_until_ready(block_forward(x, w_bf16, b_f32))
    ref_full = block_forward_ref(x, w_bf16, b_f32, 0, N_BLOCKS)
    np.testing.assert_allclose(np.asarray(out_full), np.asarray(ref_full),
                               rtol=2e-2, atol=2e-2)

    print("KERNEL_OK")
</pallas_src>

<mosaic_0001>
module attributes {stable_mosaic.version = 11 : i64} {
  func.func @_block_seq_kernel(%arg0: i32, %arg1: i32, %arg2: memref<1xi32, #tpu.memory_space<smem>>, %arg3: memref<8x128xf32, #tpu.memory_space<vmem>>, %arg4: memref<1x128x128xf32, #tpu.memory_space<vmem>>, %arg5: memref<1x1x128xf32, #tpu.memory_space<vmem>>, %arg6: memref<8x128xf32, #tpu.memory_space<vmem>>, %arg7: memref<8x128xf32, #tpu.memory_space<vmem>>) attributes {dimension_semantics = [#tpu.dimension_semantics<parallel>, #tpu.dimension_semantics<arbitrary>], iteration_bounds = array<i64: 2, 2>, scalar_prefetch = 1 : i64, scratch_operands = 1 : i64, tpu.core_type = #tpu.core_type<tc>, window_params = [{transform_indices = @transform_0, window_bounds = array<i64: 8, 128>}, {transform_indices = @transform_1, window_bounds = array<i64: 1, 128, 128>}, {transform_indices = @transform_2, window_bounds = array<i64: 1, 1, 128>}, {transform_indices = @transform_3, window_bounds = array<i64: 8, 128>}]} {
    %c0_i32 = arith.constant 0 : i32
    %0 = arith.cmpi eq, %arg1, %c0_i32 : i32
    %1 = arith.extui %0 : i1 to i32
    %c0_i32_0 = arith.constant 0 : i32
    %2 = arith.cmpi ne, %1, %c0_i32_0 : i32
    scf.if %2 {
      %c0_12 = arith.constant 0 : index
      %c0_13 = arith.constant 0 : index
      %17 = vector.load %arg3[%c0_12, %c0_13] : memref<8x128xf32, #tpu.memory_space<vmem>>, vector<8x128xf32>
      %c0_14 = arith.constant 0 : index
      %c0_15 = arith.constant 0 : index
      %18 = vector.load %arg7[%c0_14, %c0_15] : memref<8x128xf32, #tpu.memory_space<vmem>>, vector<8x128xf32>
      tpu.vector_store %arg7[%c0_14, %c0_15], %17 {strides = array<i32>} : memref<8x128xf32, #tpu.memory_space<vmem>>, vector<8x128xf32>,
    } else {
    }
    %c0 = arith.constant 0 : index
    %c0_1 = arith.constant 0 : index
    %3 = vector.load %arg7[%c0, %c0_1] : memref<8x128xf32, #tpu.memory_space<vmem>>, vector<8x128xf32>
    %c0_2 = arith.constant 0 : index
    %c0_3 = arith.constant 0 : index
    %c0_4 = arith.constant 0 : index
    %4 = vector.load %arg4[%c0_2, %c0_3, %c0_4] : memref<1x128x128xf32, #tpu.memory_space<vmem>>, vector<1x128x128xf32>
    %5 = vector.shape_cast %4 : vector<1x128x128xf32> to vector<128x128xf32>
    %cst = arith.constant dense<0.000000e+00> : vector<8x128xf32>
    %6 = tpu.matmul %3, %5, %cst {dimension_numbers = #tpu.dot_dimension_numbers<[1], [0], [0], [1], [0, 0, 1, 1], [], []>} : vector<8x128xf32>, vector<128x128xf32>, vector<8x128xf32> -> vector<8x128xf32>
    %c0_5 = arith.constant 0 : index
    %c0_6 = arith.constant 0 : index
    %c0_7 = arith.constant 0 : index
    %7 = vector.load %arg5[%c0_5, %c0_6, %c0_7] : memref<1x1x128xf32, #tpu.memory_space<vmem>>, vector<1x1x128xf32>
    %8 = vector.shape_cast %7 : vector<1x1x128xf32> to vector<1x128xf32>
    %9 = vector.broadcast %8 : vector<1x128xf32> to vector<8x128xf32>
    %10 = arith.addf %6, %9 : vector<8x128xf32>
    %cst_8 = arith.constant 0.000000e+00 : f32
    %11 = vector.broadcast %cst_8 : f32 to vector<8x128xf32>
    %12 = arith.maximumf %10, %11 : vector<8x128xf32>
    %c0_9 = arith.constant 0 : index
    %c0_10 = arith.constant 0 : index
    %13 = vector.load %arg7[%c0_9, %c0_10] : memref<8x128xf32, #tpu.memory_space<vmem>>, vector<8x128xf32>
    tpu.vector_store %arg7[%c0_9, %c0_10], %12 {strides = array<i32>} : memref<8x128xf32, #tpu.memory_space<vmem>>, vector<8x128xf32>,
    %c1_i32 = arith.constant 1 : i32
    %14 = arith.cmpi eq, %arg1, %c1_i32 : i32
    %15 = arith.extui %14 : i1 to i32
    %c0_i32_11 = arith.constant 0 : i32
    %16 = arith.cmpi ne, %15, %c0_i32_11 : i32
    scf.if %16 {
      %c0_12 = arith.constant 0 : index
      %c0_13 = arith.constant 0 : index
      %17 = vector.load %arg7[%c0_12, %c0_13] : memref<8x128xf32, #tpu.memory_space<vmem>>, vector<8x128xf32>
      %c0_14 = arith.constant 0 : index
      %c0_15 = arith.constant 0 : index
      %18 = vector.load %arg6[%c0_14, %c0_15] : memref<8x128xf32, #tpu.memory_space<vmem>>, vector<8x128xf32>
      tpu.vector_store %arg6[%c0_14, %c0_15], %17 {strides = array<i32>} : memref<8x128xf32, #tpu.memory_space<vmem>>, vector<8x128xf32>,
    } else {
    }
    return
  }
  func.func @transform_0(%arg0: i32, %arg1: i32, %arg2: memref<1xi32, #tpu.memory_space<smem>>) -> (i32, i32) {
    %c0_i32 = arith.constant 0 : i32
    %c0_i32_0 = arith.constant 0 : i32
    return %arg0, %c0_i32 : i32, i32
  }
  func.func @transform_1(%arg0: i32, %arg1: i32, %arg2: memref<1xi32, #tpu.memory_space<smem>>) -> (i32, i32, i32) {
    %c0 = arith.constant 0 : index
    %0 = memref.load %arg2[%c0] : memref<1xi32, #tpu.memory_space<smem>>
    %1 = arith.addi %0, %arg1 : i32
    %c0_i32 = arith.constant 0 : i32
    %c0_i32_0 = arith.constant 0 : i32
    %c0_i32_1 = arith.constant 0 : i32
    return %1, %c0_i32, %c0_i32_0 : i32, i32, i32
  }
  func.func @transform_2(%arg0: i32, %arg1: i32, %arg2: memref<1xi32, #tpu.memory_space<smem>>) -> (i32, i32, i32) {
    %c0 = arith.constant 0 : index
    %0 = memref.load %arg2[%c0] : memref<1xi32, #tpu.memory_space<smem>>
    %1 = arith.addi %0, %arg1 : i32
    %c0_i32 = arith.constant 0 : i32
    %c0_i32_0 = arith.constant 0 : i32
    %c0_i32_1 = arith.constant 0 : i32
    return %1, %c0_i32, %c0_i32_0 : i32, i32, i32
  }
  func.func @transform_3(%arg0: i32, %arg1: i32, %arg2: memref<1xi32, #tpu.memory_space<smem>>) -> (i32, i32) {
    %c0_i32 = arith.constant 0 : i32
    %c0_i32_0 = arith.constant 0 : i32
    return %arg0, %c0_i32 : i32, i32
  }
}

</mosaic_0001>

<bundles_post_ra>
// kernel: tpu_custom_call.1
= control target key start
LH: loop header
LB: loop body
LE: loop exit
PB: predicated region body
PF: predicated region fallthrough
CT: control target
= control target key end

     0   :  { %s1273_s0 = inlined_call_operand.<no memory space> [shape: s32[1], index: 0, kind: input, shape index: {}]   ;;  %s1274_s1 = inlined_call_operand.hbm [shape: f32[16,128], index: 1, kind: input, shape index: {}]   ;;  %s1275_s2 = inlined_call_operand.hbm [shape: f32[4,128,128], index: 2, kind: input, shape index: {}]   ;;  %s1276_s3 = inlined_call_operand.hbm [shape: f32[4,1,128], index: 3, kind: input, shape index: {}]   ;;  %s1277_s4 = inlined_call_operand.hbm [shape: f32[16,128], index: 4, kind: output, shape index: {}]  }
   0x1   :  { %1287 = sst [smem:[#allocation26_spill]] %s1275_s2 }
   0x2   :  { %1288 = sst [smem:[#allocation27_spill]] %s1277_s4 }
   0x3   :  { %9 = sst [smem:[#allocation4]] %s1273_s0 }
   0x4   :  { %10 = vsyncpa [#allocation6], 0 }
   0x5   :  { %12 = vsyncpa [#allocation6 + $0x1], 0 }
   0x6   :  { %13 = vsyncpa [#allocation9], 0 }
   0x7   :  { %15 = vsyncpa [#allocation9 + $0x1], 0 }
   0x8   :  { %16 = vsyncpa [#allocation7], 0 }
   0x9   :  { %18 = vsyncpa [#allocation7 + $0x1], 0  ;;  %s920_s17 = smov 0   ;;  %s922_s18 = smov 0  }
   0xa   :  { %s924_s19 = smov 0   ;;  %s926_s20 = smov 0  }
   0xb   :  { %s928_s21 = smov 0   ;;  %s930_s22 = smov 0  }
   0xc   :  { %s932_s23 = smov 0   ;;  %s934_s0 = smov 0  }
   0xd   :  { %s936_s24 = smov 0   ;;  %s938_s25 = smov 0  }
   0xe   :  { %s940_s26 = smov 0   ;;  %s942_s27 = smov 0  }
   0xf   :  { %s944_s28 = smov 0   ;;  %s946_s29 = smov 0  }
  0x10 LB: > { %1289 = sst [smem:[#allocation16_spill]] %s856_s22  ;;  %p1280_p0 = scmp.eq.s32.totalorder %s888_s29, 0  ;;  %s888_s29 = sphi %s946_s29, %s24_s29   ;;  %s884_s28 = sphi %s944_s28, %s1324_s28   ;;  %s880_s27 = sphi %s942_s27, %s1323_s27   ;;  %s876_s26 = sphi %s940_s26, %s1322_s26   ;;  %s872_s25 = sphi %s938_s25, %s1321_s25   ;;  %s868_s24 = sphi %s936_s24, %s1320_s24   ;;  %s864_s0 = sphi %s934_s0, %s1331_s0   ;;  %s860_s23 = sphi %s932_s23, %s1330_s23   ;;  %s856_s22 = sphi %s930_s22, %s1318_s22   ;;  %s852_s21 = sphi %s928_s21, %s1329_s21   ;;  %s848_s20 = sphi %s926_s20, %s1328_s20   ;;  %s844_s19 = sphi %s924_s19, %s1327_s19   ;;  %s840_s18 = sphi %s922_s18, %s1326_s18   ;;  %s836_s17 = sphi %s920_s17, %s1325_s17  }
  0x11   : > { %1290 = sst [smem:[#allocation17_spill]] %s868_s24  ;;  %p80_p1 = scmp.ne.s32.totalorder %s856_s22, %s852_s21 }
  0x12   : > { %1291 = sst [smem:[#allocation18_spill]] %s876_s26  ;;  %p86_p2 = scmp.ne.s32.totalorder %s852_s21, %s848_s20 }
  0x13   : > { %1292 = sst [smem:[#allocation19_spill]] %s880_s27  ;;  %p82_p3 = por %p80_p1, %p1280_p0 }
  0x14   : > { %1293 = sst [smem:[#allocation20_spill]] %s884_s28  ;;  %p527_p4 = scmp.lt.s32.totalorder %s888_s29, 4 }
  0x15   : > { %s991_s30 = sld [smem:[#allocation4]]  ;;  %s185_s6 = sand.u32 1, %s888_s29  }
  0x16   : > { %s187_s7 = sand.u32 1, %s856_s22   ;;  %s1294_s2 = sld [smem:[#allocation26_spill]] }
  0x17   : > { %s491_s8 = sshll.u32 %s187_s7, 7  ;;  %p1013_p5 = pnand %p527_p4, %p82_p3 }
  0x18   : > { %s189_s11 = scalar_lea.vmem [#allocation8], %s491_s8  ;;  %s1017_s7 = scalar_lea.sflag [#allocation9], %s185_s6 }
  0x19   : > { %s199_s12 = sshll.u32 %s189_s11, 4  ;;  %p648_p7 = pneg %p1013_p5  ;;  %s200_s12 = int_to_ptr.vmem [resolvable:$true] %s199_s12 }
  0x1b   : > { %s1005_s9 = sadd.s32 %s880_s27, %s991_s30 }
  0x1c   : > { %s504_s10 = sshll.u32 %s1005_s9, 7  ;;  %s651_s11 = scalar_lea.hbm %s1294_s2, 512 }
  0x1d   : > { %s196_s15 = scalar_lea.hbm %s1294_s2, %s504_s10 }
  0x1e   : > { %s197_s16 = sshll.u32 %s196_s15, 4  ;;  %s198_s16 = int_to_ptr.hbm [resolvable:$true] %s197_s16 }
  0x1f   : > { %s644_s4 = sshra.s32 %s198_s16, 4  ;;  %s645_s4 = int_to_ptr.hbm [resolvable:$true] %s644_s4 }
  0x20   : > { %s646_s26 = scalar_lea.hbm %s645_s4, 128  ;;  %p652_p10 = scmp.lt.s32.totalorder %s645_s4, %s1294_s2 }
  0x21   : > { %p647_p6 = scmp.ne.s32.totalorder %s645_s4, %s646_s26  ;;  %p653_p11 = scmp.lt.s32.totalorder %s651_s11, %s646_s26 }
  0x23   : > { %p649_p8 = pnand %p648_p7, %p647_p6  ;;  %p654_p12 = por %p653_p11, %p652_p10 }
  0x25   : > { %p650_p9 = pneg %p649_p8 }
  0x27   : > { %p655_p13 = pnand %p654_p12, %p650_p9 }
  0x29   : > { %658 = shalt.err (!%p655_p13)
}
  0x2a   : > { %s890_s6 = smov 128   ;;  %s891_s4 = smov 8  }
  0x2b   : > { %519 = dma.hbm_to_vmem [thread:$0]  (!%p1013_p5), %s198_s16, 2048, %s200_s12, %s1017_s7, %s890_s6, %s890_s6, %s891_s4  }
  0x2c   : > { %p494_p1 = scmp.ge.s32.totalorder %s888_s29, 1  ;;  %p226_p3 = scmp.lt.s32.totalorder %s888_s29, 5 }
  0x2d   : > { %s1037_s15 = sadd.s32 4294967295, %s888_s29   ;;  %s486_s8 = sadd.s32 4294967294, %s888_s29  }
  0x2e   : > { %p1032_p6 = pnand %p494_p1, %p226_p3  ;;  %s33_s10 = sadd.s32 1, %s880_s27 }
  0x2f   : > { %p34_p7 = scmp.ge.s32.totalorder %s33_s10, 2  ;;  %s36_s5 = sadd.s32 1, %s884_s28 }
  0x30   : > { %s43_s12 = sadd.s32 1, %s868_s24  ;;  %p50_p5 = scmp.ne.s32.totalorder %s868_s24, %s864_s0 }
  0x31   : > { %s1333_s10 = smov (%p34_p7, %s33_s10), 0  ;;  %s1335_s5 = smov (!%p34_p7, %s36_s5), %s884_s28 }
  0x32   : > { %1297 = sst [smem:[#allocation21_spill]] %s1333_s10  ;;  %p1053_p8 = por %p1280_p0, %p50_p5 }
  0x33   : > { %p56_p9 = scmp.ne.s32.totalorder %s864_s0, %s860_s23  ;;  %p38_p10 = scmp.ge.s32.totalorder %s1335_s5, 2 }
  0x34   : > { %p57_p11 = scmp.eq.s32.totalorder %s1037_s15, 0  ;;  %s69_s11 = sadd.s32 %s991_s30, %s1333_s10 }
  0x35   : > { %p140_p12 = scmp.eq.s32.totalorder %s1037_s15, 3  ;;  %s1337_s5 = smov (%p38_p10, %s1335_s5), 0 }
  0x36   : > { %1299 = sst [smem:[#allocation22_spill]] %s1337_s5  ;;  %p1070_p13 = por %p57_p11, %p56_p9 }
  0x37   : > { %s70_s14 = ssub.s32 %s1005_s9, %s69_s11  ;;  %s40_s6 = ssub.s32 %s884_s28, %s1337_s5 }
  0x38   : > { %p71_p1 = scmp.eq.s32.totalorder %s70_s14, 0  ;;  %p41_p3 = scmp.eq.s32.totalorder %s40_s6, 0 }
  0x39   : > { %p1082_p7 = por %p86_p2, %p57_p11  ;;  %s1302_s4 = sadd.s32 1, %s856_s22 }
  0x3a   : > { %s1090_s2 = scalar_select %p71_p1, %s856_s22, %s1302_s4  }
  0x3b   : > { %s1093_s10 = scalar_select %p41_p3, %s868_s24, %s43_s12  }
  0x3c   : > { %1303 = sst [smem:[#allocation23_spill]] %s1090_s2  ;;  %p1098_p10 = por %p140_p12, %p50_p5 }
  0x3d   : > { %1304 = sst [smem:[#allocation24_spill]] %s1093_s10  ;;  %p146_p0 = scmp.eq.s32.totalorder %s486_s8, 3 }
  0x3e   : > { %s166_s20 = sand.u32 1, %s868_s24   ;;  %s490_s6 = sshll.u32 %s884_s28, 3 }
  0x3f   : > { %p1107_p2 = por %p146_p0, %p56_p9  ;;  %s489_s12 = sshll.u32 %s166_s20, 3 }
  0x40   : > { %s174_s10 = scalar_lea.hbm %s1274_s1, %s490_s6  ;;  %s170_s24 = scalar_lea.vmem [#allocation5], %s489_s12 }
  0x41   : > { %s1306_s4 = scalar_select %p1107_p2, 1, 0 }
  0x42   : > { %s176_s8 = sshll.u32 %s174_s10, 4  ;;  %s178_s2 = sshll.u32 %s170_s24, 4  ;;  %s177_s8 = int_to_ptr.hbm [resolvable:$true] %s176_s8  ;;  %s179_s2 = int_to_ptr.vmem [resolvable:$true] %s178_s2 }
  0x43   : > { %1307 = sst [smem:[#allocation25_spill]] %s1306_s4  ;;  %p514_p5 = pnand %p527_p4, %p1053_p8 }
  0x44   : > { %s167_s28 = scalar_lea.sflag [#allocation6], %s166_s20  ;;  %s103_s22 = sadd.s32 1, %s844_s19 }
  0x45   : > { %516 = dma.hbm_to_vmem [thread:$0]  (!%p514_p5), %s177_s8, 128, %s179_s2, %s167_s28  }
  0x46   : > { %s1121_s4 = scalar_select %p71_p1, %s844_s19, %s103_s22  }
  0x47   : > { %p110_p0 = scmp.ne.s32.totalorder %s844_s19, %s840_s18  ;;  %p116_p9 = scmp.ne.s32.totalorder %s840_s18, %s836_s17 }
  0x48   : > { %s211_s27 = sand.u32 1, %s844_s19   ;;  %s217_s10 = scalar_lea.hbm %s1276_s3, %s1005_s9 }
  0x49   : > { %p1308_p12 = scmp.eq.s32.totalorder %s888_s29, 0  ;;  %p1136_p2 = por %p116_p9, %p57_p11 }
  0x4a   : > { %s219_s16 = sshll.u32 %s217_s10, 4  ;;  %s212_s2 = scalar_lea.vmem [#allocation10], %s211_s27  ;;  %s220_s16 = int_to_ptr.hbm [resolvable:$true] %s219_s16 }
  0x4b   : > { %p112_p3 = por %p110_p0, %p1308_p12  ;;  %s221_s28 = sshll.u32 %s212_s2, 4  ;;  %s222_s28 = int_to_ptr.vmem [resolvable:$true] %s221_s28 }
  0x4c   : > { %s704_s22 = sshra.s32 %s220_s16, 4  ;;  %s711_s12 = scalar_lea.hbm %s1276_s3, 4  ;;  %s705_s22 = int_to_ptr.hbm [resolvable:$true] %s704_s22 }
  0x4d   : > { %p1142_p8 = pnand %p527_p4, %p112_p3  ;;  %s706_s9 = scalar_lea.hbm %s705_s22, 1 }
  0x4e   : > { %p707_p1 = scmp.ne.s32.totalorder %s705_s22, %s706_s9  ;;  %p712_p4 = scmp.lt.s32.totalorder %s705_s22, %s1276_s3 }
  0x4f   : > { %p708_p11 = pneg %p1142_p8  ;;  %p713_p9 = scmp.lt.s32.totalorder %s711_s12, %s706_s9 }
  0x51   : > { %p709_p5 = pnand %p708_p11, %p707_p1  ;;  %p714_p12 = por %p713_p9, %p712_p4 }
  0x53   : > { %p710_p0 = pneg %p709_p5 }
  0x55   : > { %p715_p3 = pnand %p714_p12, %p710_p0 }
  0x57   : > { %718 = shalt.err (!%p715_p3)
}
  0x58   : > { %522 = dma.hbm_to_vmem [thread:$0]  (!%p1142_p8), %s220_s16, 16, %s222_s28, %s1017_s7  }
  0x59   : > { %230 = sbr.rel (%p1032_p6) target bundleno = 303 (0x12f), region = 32  ;;  %s1160_s5 = sand.u32 (!%p1032_p6), 1, %s864_s0  }
  0x5a   : > { %s495_s6 = sshll.u32 (!%p1032_p6), %s1160_s5, 3  ;;  %s233_s10 = scalar_lea.sflag (!%p1032_p6), [#allocation6], %s1160_s5 }
  0x5b   : > { %s236_s2 = scalar_lea.vmem (!%p1032_p6), [#allocation5], %s495_s6 }
  0x5e   : > { %819 = dma.done.wait (%p1070_p13), %s233_s10, 128  }
  0x5f   : > { %821 = vsyncadd (%p1070_p13), %s233_s10, 4294967168  ;;  %s242_s7 = sand.u32 1, %s1037_s15   ;;  %s244_s26 = sand.u32 1, %s852_s21  }
  0x60   : > { %s496_s16 = sshll.u32 %s244_s26, 7  ;;  %s243_s28 = scalar_lea.sflag [#allocation9], %s242_s7 }
  0x61   : > { %s1170_s17 = scalar_lea.vmem [#allocation8], %s496_s16 }
  0x62   : > { %823 = dma.done.wait (%p1082_p7), %s243_s28, 2048  }
  0x63   : > { %825 = vsyncadd (%p1082_p7), %s243_s28, 4294965248  ;;  %s254_s22 = sand.u32 1, %s840_s18  }
  0x64   : > { %s1177_s9 = scalar_lea.vmem [#allocation10], %s254_s22 }
  0x65   : > { %827 = dma.done.wait (%p1136_p2), %s243_s28, 16  }
  0x66   : > { %829 = vsyncadd (%p1136_p2), %s243_s28, 4294967280  ;;  %s1183_s15 = scalar_lea.vmem [#allocation11], %s495_s6  ;;  %p498_p6 = scmp.ne.s32.totalorder %s872_s25, 0 }
  0x68   : > { %295 = sbr.rel (%p498_p6) target bundleno = 111 (0x6f), region = 48 }
  0x6d   : > { %v296_v0 = vld [vmem:[%s236_s2] sm:$0xff] }
  0x6e   : > { %297 = vst [vmem:[#allocation2] sm:$0xff] %v296_v0 }
  0x6f PF: > { %v314_v1 = vld [vmem:[%s1170_s17 + $0x78] sm:$0xff]  ;;  %v313_v2 = vld [vmem:[%s1170_s17 + $0x70] sm:$0xff]  ;;  %v312_v3 = vld [vmem:[%s1170_s17 + $0x68] sm:$0xff]  ;;  %p499_p13 = scmp.ne.s32.totalorder %s872_s25, 1 }
  0x70   : > { %319 = vmatpush.msra.mxu0 %v314_v1  ;;  %v311_v4 = vld [vmem:[%s1170_s17 + $0x60] sm:$0xff]  ;;  %v310_v5 = vld [vmem:[%s1170_s17 + $0x58] sm:$0xff]  ;;  %v309_v6 = vld [vmem:[%s1170_s17 + $0x50] sm:$0xff] }
  0x71   : > { %v308_v7 = vld [vmem:[%s1170_s17 + $0x48] sm:$0xff]  ;;  %v307_v8 = vld [vmem:[%s1170_s17 + $0x40] sm:$0xff]  ;;  %v306_v9 = vld [vmem:[%s1170_s17 + $0x38] sm:$0xff] }
  0x72   : > { %320 = vmatpush.msra.mxu0 %v313_v2  ;;  %v305_v10 = vld [vmem:[%s1170_s17 + $0x30] sm:$0xff]  ;;  %v304_v11 = vld [vmem:[%s1170_s17 + $0x28] sm:$0xff]  ;;  %v303_v12 = vld [vmem:[%s1170_s17 + $0x20] sm:$0xff] }
  0x73   : > { %v302_v13 = vld [vmem:[%s1170_s17 + $0x18] sm:$0xff]  ;;  %v301_v14 = vld [vmem:[%s1170_s17 + $0x10] sm:$0xff]  ;;  %v300_v15 = vld [vmem:[%s1170_s17 + $0x8] sm:$0xff] }
  0x74   : > { %321 = vmatpush.msra.mxu0 %v312_v3  ;;  %v299_v16 = vld [vmem:[%s1170_s17] sm:$0xff]  ;;  %v643_v18 = vld [vmem:[%s1177_s9] ss:$0 sm:$0xff] }
  0x75   : > { %v298_v17 = vld [vmem:[#allocation2] sm:$0xff] }
  0x76   : > { %322 = vmatpush.msra.mxu0 %v311_v4 }
  0x78   : > { %323 = vmatpush.msra.mxu0 %v310_v5 }
  0x7a   : > { %324 = vmatpush.msra.mxu0 %v309_v6 }
  0x7c   : > { %325 = vmatpush.msra.mxu0 %v308_v7 }
  0x7e   : > { %326 = vmatpush.msra.mxu0 %v307_v8 }
  0x80   : > { %327 = vmatpush.msra.mxu0 %v306_v9 }
  0x82   : > { %328 = vmatpush.msra.mxu0 %v305_v10 }
  0x84   : > { %329 = vmatpush.msra.mxu0 %v304_v11 }
  0x86   : > { %330 = vmatpush.msra.mxu0 %v303_v12 }
  0x88   : > { %331 = vmatpush.msra.mxu0 %v302_v13 }
  0x8a   : > { %332 = vmatpush.msra.mxu0 %v301_v14 }
  0x8c   : > { %333 = vmatpush.msra.mxu0 %v300_v15 }
  0x8e   : > { %334 = vmatpush.msra.mxu0 %v299_v16 }
  0x8f   : > { %335 = vmatmul.f32.vlgmr.msra.gmra.mxu0 %v298_v17 }
 0x10c   : > { %v336_v19 = vpop.f32.mrf.mxu0 }
 0x10d   : > { %v337_v20 = vadd.f32 %v643_v18, %v336_v19  ;;  %344 = sbr.rel (%p499_p13) target bundleno = 282 (0x11a), region = 52 }
 0x10f   : > { %v339_v21 = vmax.f32 %v337_v20, 0.0 }
 0x111   : > { %340 = vst [vmem:[#allocation2] sm:$0xff] %v339_v21 }
 0x118   : > { %v345_v22 = vld [vmem:[#allocation2] sm:$0xff] }
 0x119   : > { %346 = vst [vmem:[%s1183_s15] sm:$0xff] %v345_v22 }
 0x11a PF: > { %s1311_s13 = sld [smem:[#allocation18_spill]]  ;;  %s360_s27 = sshll.u32 %s1183_s15, 4  ;;  %s361_s27 = int_to_ptr.vmem [resolvable:$true] %s360_s27 }
 0x11b   : > { %s1312_s20 = sld [smem:[#allocation27_spill]]  ;;  %s348_s10 = scalar_lea.sflag [#allocation7], %s1160_s5 }
 0x120   : > { %s501_s30 = sshll.u32 %s1311_s13, 3 }
 0x121   : > { %s1313_s12 = smov %s1312_s20  ;;  %s358_s8 = scalar_lea.hbm %s1312_s20, %s501_s30 }
 0x122   : > { %s362_s6 = sshll.u32 %s358_s8, 4  ;;  %s754_s16 = scalar_lea.hbm %s1313_s12, 16  ;;  %s363_s6 = int_to_ptr.hbm [resolvable:$true] %s362_s6 }
 0x123   : > { %s748_s25 = sshra.s32 %s363_s6, 4  ;;  %s749_s25 = int_to_ptr.hbm [resolvable:$true] %s748_s25 }
 0x124   : > { %s750_s2 = scalar_lea.hbm %s749_s25, 8  ;;  %p755_p1 = scmp.lt.s32.totalorder %s749_s25, %s1313_s12 }
 0x125   : > { %p751_p7 = scmp.ne.s32.totalorder %s749_s25, %s750_s2  ;;  %p756_p11 = scmp.lt.s32.totalorder %s754_s16, %s750_s2 }
 0x127   : > { %p752_p2 = pnand %p751_p7, %p1098_p10  ;;  %p757_p5 = por %p756_p11, %p755_p1 }
 0x129   : > { %p753_p8 = pneg %p752_p2 }
 0x12b   : > { %p758_p0 = pnand %p757_p5, %p753_p8 }
 0x12d   : > { %761 = shalt.err (!%p758_p0)
}
 0x12e   : > { %511 = dma.vmem_to_hbm [thread:$0]  (%p1098_p10), %s361_s27, 128, %s363_s6, %s348_s10  }
 0x12f PF: > { %s1314_s5 = sld [smem:[#allocation25_spill]]  ;;  %p528_p4 = scmp.ge.s32.totalorder %s888_s29, 2 }
 0x130   : > { %s374_s22 = sand.u32 1, %s860_s23  }
 0x131   : > { %s375_s9 = scalar_lea.sflag [#allocation7], %s374_s22 }
 0x135   : > { %p1315_p9 = scmp.ne.s32.totalorder %s1314_s5, 0 }
 0x137   : > { %p524_p12 = pnand %p528_p4, %p1315_p9 }
 0x139   : > { %p525_p3 = pneg %p524_p12 }
 0x13b   : > { %831 = dma.done.wait (%p525_p3), %s375_s9, 128  }
 0x13c   : > { %833 = vsyncadd (%p525_p3), %s375_s9, 4294967168  ;;  %s24_s29 = sadd.s32 1, %s888_s29   ;;  %s1317_s11 = sld [smem:[#allocation16_spill]] }
 0x13d   : > { %p1226_p6 = scmp.ge.s32.totalorder %s24_s29, 6   ;;  %s1318_s22 = sld [smem:[#allocation23_spill]] }
 0x13e   : > { %s1319_s13 = sld [smem:[#allocation17_spill]]  ;;  %s1325_s17 = smov %s840_s18 }
 0x13f   : > { %s1320_s24 = sld [smem:[#allocation24_spill]]  ;;  %s1326_s18 = smov %s844_s19 }
 0x140   : > { %s1321_s25 = sld [smem:[#allocation19_spill]]  ;;  %s1327_s19 = smov %s1121_s4 }
 0x141   : > { %s1322_s26 = sld [smem:[#allocation20_spill]]  ;;  %s1328_s20 = smov %s852_s21 }
 0x142   : > { %s1323_s27 = sld [smem:[#allocation21_spill]]  ;;  %s1329_s21 = smov %s1317_s11 }
 0x143   : > { %s1324_s28 = sld [smem:[#allocation22_spill]]  ;;  %s1330_s23 = smov %s864_s0 }
 0x144   : > { %s1331_s0 = smov %s1319_s13  ;;  %23 = sbr.rel (!%p1226_p6) target bundleno = 16 (0x10), region = 109 }
 0x149   :  { %381 = vsyncpa [#allocation6], 1 }
 0x14a   :  { %383 = vsyncpa [#allocation6 + $0x1], 1 }
 0x14b   :  { %384 = vsyncpa [#allocation9], 1 }
 0x14c   :  { %386 = vsyncpa [#allocation9 + $0x1], 1 }
 0x14d   :  { %387 = vsyncpa [#allocation7], 1 }
 0x14e   :  { %389 = vsyncpa [#allocation7 + $0x1], 1 }

</bundles_post_ra>
